<compile_context>
chip_gen: v6e
topology: v6e:2x2x1
jax: 0.10.0
libtpu: 0.0.40
codegen_flags: <defaults>
</compile_context>

<pallas_src>
import functools

import jax
import jax.numpy as jnp
from jax.experimental import pallas as pl
from jax.experimental.pallas import tpu as pltpu


# --------------------------- fused decoder kernel ---------------------------
def _make_decoder_kernel(L, B, H, O_PAD):
    def kernel(x_ref, lens_ref, wih_ref, whh_ref, b_ref, fcw_ref, fcb_ref,
               out_ref):
        # Hoisted, time-parallel input projection: one big MXU matmul instead of
        # L tiny ones on the serial critical path.  (L*B, E) @ (E, H) -> f32.
        p_all = jnp.dot(x_ref[...], wih_ref[...],
                        preferred_element_type=jnp.float32) + b_ref[...]

        lens = lens_ref[...]          # (B, 1) int32, resident in VMEM
        whh = whh_ref[...]            # (H, H)   bf16
        fcw = fcw_ref[...]            # (H, O_PAD) bf16
        fcb = fcb_ref[...]            # (1, O_PAD) f32

        h = jnp.zeros((B, H), jnp.float32)
        # L is a small static constant here, so the recurrence is fully unrolled
        # inside a single kernel invocation: no per-step grid/pipeline overhead,
        # static 128-lane-aligned unmasked output stores.
        # TODO(synk): for long sequences switch to lax.fori_loop + dynamic stores.
        for t in range(L):
            pre = jnp.dot(h.astype(jnp.bfloat16), whh,
                          preferred_element_type=jnp.float32)
            pre = pre + p_all[t * B:(t + 1) * B, :]
            h_new = jnp.tanh(pre)                     # f32 elementwise (VPU/EUP)
            valid = lens > t                          # (B, 1) bool
            out_t = jnp.where(valid, h_new, 0.0)      # pad_packed -> zero rows
            h = jnp.where(valid, h_new, h)            # freeze finished sequences
            # Fused fc: per-step logits, written batch-major & lane-dense.
            logits_t = jnp.dot(out_t.astype(jnp.bfloat16), fcw,
                               preferred_element_type=jnp.float32) + fcb
            out_ref[:, t * O_PAD:(t + 1) * O_PAD] = logits_t

    return kernel


def decoder_fused_pallas(x2d, lens2d, wih_t, whh_t, bias2d, fcw_t, fcb2d,
                         *, L, B, H, O_PAD):
    """x2d: (L*B, E) bf16 time-major rows.  Returns (B, L*O_PAD) f32 logits."""
    LB, E = x2d.shape
    kernel = _make_decoder_kernel(L, B, H, O_PAD)
    return pl.pallas_call(
        kernel,
        out_shape=jax.ShapeDtypeStruct((B, L * O_PAD), jnp.float32),
        in_specs=[
            pl.BlockSpec((LB, E), lambda: (0, 0)),        # x (time-major rows)
            pl.BlockSpec((B, 1), lambda: (0, 0)),         # seq_lens
            pl.BlockSpec((E, H), lambda: (0, 0)),         # W_ih^T
            pl.BlockSpec((H, H), lambda: (0, 0)),         # W_hh^T
            pl.BlockSpec((1, H), lambda: (0, 0)),         # b_ih + b_hh
            pl.BlockSpec((H, O_PAD), lambda: (0, 0)),     # W_fc^T (lane-padded)
            pl.BlockSpec((1, O_PAD), lambda: (0, 0)),     # b_fc   (lane-padded)
        ],
        out_specs=pl.BlockSpec((B, L * O_PAD), lambda: (0, 0)),
        compiler_params=pltpu.CompilerParams(vmem_limit_bytes=32 * 1024 * 1024),
    )(x2d, lens2d, wih_t, whh_t, bias2d, fcw_t, fcb2d)


# ----------------------------- Decoder forward -------------------------------
def decoder_forward(params, image_features, captions, seq_lens, max_len):
    """Mirrors Decoder.forward; returns (B * max_len, output_size) f32."""
    B = captions.shape[0]
    E = params["w_ih"].shape[1]
    H = params["w_hh"].shape[0]
    O = params["fc_w"].shape[0]
    L = int(max_len)

    B_pad = ((B + 7) // 8) * 8            # fill f32 sublanes
    O_PAD = ((O + 127) // 128) * 128      # lane-dense fc output

    # Embedding lookup + image-feature concat (plain-JAX gather glue).
    cap = captions[:, :-1]                                           # (B, Tc-1)
    emb = jnp.take(params["embedding"], cap, axis=0)                 # (B, Tc-1, E)
    x = jnp.concatenate([image_features[:, None, :], emb], axis=1)   # (B, Tc, E)
    x = x[:, :L]                                                     # (B, L, E)
    x_tm = jnp.transpose(x, (1, 0, 2))                               # (L, B, E)
    x_tm = jnp.pad(x_tm, ((0, 0), (0, B_pad - B), (0, 0)))
    x2d = x_tm.reshape(L * B_pad, E).astype(jnp.bfloat16)            # time-major rows

    lens2d = jnp.pad(seq_lens.astype(jnp.int32),
                     (0, B_pad - B)).reshape(B_pad, 1)

    # MXU operands in bf16; biases/accumulation in f32.
    wih_t = params["w_ih"].T.astype(jnp.bfloat16)                    # (E, H)
    whh_t = params["w_hh"].T.astype(jnp.bfloat16)                    # (H, H)
    bias2d = (params["b_ih"] + params["b_hh"]).reshape(1, H).astype(jnp.float32)
    fcw_t = jnp.zeros((H, O_PAD), jnp.float32).at[:, :O].set(params["fc_w"].T)
    fcw_t = fcw_t.astype(jnp.bfloat16)
    fcb2d = jnp.zeros((1, O_PAD), jnp.float32).at[:, :O].set(params["fc_b"])

    out = decoder_fused_pallas(x2d, lens2d, wih_t, whh_t, bias2d, fcw_t, fcb2d,
                               L=L, B=B_pad, H=H, O_PAD=O_PAD)       # (B_pad, L*O_PAD)

    # Already batch-major: row (b, t) -> b*L + t, matching out.view(-1, H) @ fc.
    out = out.reshape(B_pad, L, O_PAD)[:B, :, :O].reshape(B * L, O)
    return out


# ----------------------------- Pure-JAX reference ----------------------------
def decoder_forward_ref(params, image_features, captions, seq_lens, max_len):
    H = params["w_hh"].shape[0]
    B = captions.shape[0]
    cap = captions[:, :-1]
    emb = jnp.take(params["embedding"], cap, axis=0)
    x = jnp.concatenate([image_features[:, None, :], emb], axis=1)[:, :max_len]
    x_tm = jnp.transpose(x, (1, 0, 2)).astype(jnp.float32)
    bias = params["b_ih"] + params["b_hh"]

    def step(h, inp):
        x_t, t = inp
        h_new = jnp.tanh(x_t @ params["w_ih"].T + h @ params["w_hh"].T + bias)
        valid = (t < seq_lens)[:, None]
        out_t = jnp.where(valid, h_new, 0.0)
        h = jnp.where(valid, h_new, h)
        return h, out_t

    h0 = jnp.zeros((B, H), jnp.float32)
    _, out_tm = jax.lax.scan(step, h0, (x_tm, jnp.arange(max_len)))
    out = jnp.transpose(out_tm, (1, 0, 2)).reshape(-1, H)
    return out @ params["fc_w"].T + params["fc_b"]


# ----------------------------- main ------------------------------------------
if __name__ == "__main__":
    VOCAB = 16
    EMB = 32           # embedding_size (== image feature size)
    HID = 32           # hidden_dim
    OUT = 16           # output_size
    B = 2
    TC = 8             # caption length

    key = jax.random.PRNGKey(0)
    ks = jax.random.split(key, 8)

    emb_w = jax.random.normal(ks[0], (VOCAB, EMB), jnp.float32) * 0.1
    emb_w = emb_w.at[0].set(0.0)   # padding_idx=0 -> zero row

    s = 1.0 / jnp.sqrt(HID)
    params = {
        "embedding": emb_w,
        "w_ih": jax.random.uniform(ks[1], (HID, EMB), jnp.float32, -s, s),
        "w_hh": jax.random.uniform(ks[2], (HID, HID), jnp.float32, -s, s),
        "b_ih": jax.random.uniform(ks[3], (HID,), jnp.float32, -s, s),
        "b_hh": jax.random.uniform(ks[4], (HID,), jnp.float32, -s, s),
        "fc_w": jax.random.uniform(ks[5], (OUT, HID), jnp.float32, -s, s),
        "fc_b": jax.random.uniform(ks[6], (OUT,), jnp.float32, -s, s),
    }

    image_features = jax.random.normal(ks[7], (B, EMB), jnp.float32)
    captions = jax.random.randint(jax.random.PRNGKey(1), (B, TC), 1, VOCAB,
                                  dtype=jnp.int32)
    seq_len_list = [8, 5]
    seq_lens = jnp.array(seq_len_list, jnp.int32)
    max_len = max(seq_len_list)    # static Python int -> no host/device sync

    fwd = jax.jit(functools.partial(decoder_forward, max_len=max_len))
    out = jax.block_until_ready(fwd(params, image_features, captions, seq_lens))

    ref = decoder_forward_ref(params, image_features, captions, seq_lens, max_len)
    assert out.shape == (B * max_len, OUT), out.shape
    # Tolerance accounts for bf16 MXU operands (f32 accumulation) vs f32 reference.
    assert jnp.allclose(out, ref, atol=3e-2, rtol=3e-2), "mismatch vs reference"

    print("KERNEL_OK")
</pallas_src>

<mosaic_0001>
module attributes {stable_mosaic.version = 11 : i64} {
  func.func @kernel(%arg0: memref<64x32xbf16, #tpu.memory_space<vmem>>, %arg1: memref<8x1xi32, #tpu.memory_space<vmem>>, %arg2: memref<32x32xbf16, #tpu.memory_space<vmem>>, %arg3: memref<32x32xbf16, #tpu.memory_space<vmem>>, %arg4: memref<1x32xf32, #tpu.memory_space<vmem>>, %arg5: memref<32x128xbf16, #tpu.memory_space<vmem>>, %arg6: memref<1x128xf32, #tpu.memory_space<vmem>>, %arg7: memref<8x1024xf32, #tpu.memory_space<vmem>>) attributes {dimension_semantics = [], scalar_prefetch = 0 : i64, scratch_operands = 0 : i64, tpu.core_type = #tpu.core_type<tc>} {
    %c0 = arith.constant 0 : index
    %c0_0 = arith.constant 0 : index
    %0 = vector.load %arg0[%c0, %c0_0] : memref<64x32xbf16, #tpu.memory_space<vmem>>, vector<64x32xbf16>
    %c0_1 = arith.constant 0 : index
    %c0_2 = arith.constant 0 : index
    %1 = vector.load %arg2[%c0_1, %c0_2] : memref<32x32xbf16, #tpu.memory_space<vmem>>, vector<32x32xbf16>
    %cst = arith.constant dense<0.000000e+00> : vector<64x32xf32>
    %2 = tpu.matmul %0, %1, %cst {dimension_numbers = #tpu.dot_dimension_numbers<[1], [0], [0], [1], [0, 0, 1, 1], [], []>} : vector<64x32xbf16>, vector<32x32xbf16>, vector<64x32xf32> -> vector<64x32xf32>
    %c0_3 = arith.constant 0 : index
    %c0_4 = arith.constant 0 : index
    %3 = vector.load %arg4[%c0_3, %c0_4] : memref<1x32xf32, #tpu.memory_space<vmem>>, vector<1x32xf32>
    %4 = vector.broadcast %3 : vector<1x32xf32> to vector<64x32xf32>
    %5 = arith.addf %2, %4 : vector<64x32xf32>
    %c0_5 = arith.constant 0 : index
    %c0_6 = arith.constant 0 : index
    %6 = vector.load %arg1[%c0_5, %c0_6] : memref<8x1xi32, #tpu.memory_space<vmem>>, vector<8x1xi32>
    %c0_7 = arith.constant 0 : index
    %c0_8 = arith.constant 0 : index
    %7 = vector.load %arg3[%c0_7, %c0_8] : memref<32x32xbf16, #tpu.memory_space<vmem>>, vector<32x32xbf16>
    %c0_9 = arith.constant 0 : index
    %c0_10 = arith.constant 0 : index
    %8 = vector.load %arg5[%c0_9, %c0_10] : memref<32x128xbf16, #tpu.memory_space<vmem>>, vector<32x128xbf16>
    %c0_11 = arith.constant 0 : index
    %c0_12 = arith.constant 0 : index
    %9 = vector.load %arg6[%c0_11, %c0_12] : memref<1x128xf32, #tpu.memory_space<vmem>>, vector<1x128xf32>
    %cst_13 = arith.constant 0.000000e+00 : f32
    %10 = vector.broadcast %cst_13 : f32 to vector<8x32xf32>
    %11 = arith.truncf %10 : vector<8x32xf32> to vector<8x32xbf16>
    %cst_14 = arith.constant dense<0.000000e+00> : vector<8x32xf32>
    %12 = tpu.matmul %11, %7, %cst_14 {dimension_numbers = #tpu.dot_dimension_numbers<[1], [0], [0], [1], [0, 0, 1, 1], [], []>} : vector<8x32xbf16>, vector<32x32xbf16>, vector<8x32xf32> -> vector<8x32xf32>
    %13 = vector.extract_strided_slice %5 {offsets = [0, 0], sizes = [8, 32], strides = [1, 1]} : vector<64x32xf32> to vector<8x32xf32>
    %14 = arith.addf %12, %13 : vector<8x32xf32>
    %15 = math.tanh %14 : vector<8x32xf32>
    %c0_i32 = arith.constant 0 : i32
    %16 = vector.broadcast %c0_i32 : i32 to vector<8x1xi32>
    %17 = arith.cmpi sgt, %6, %16 : vector<8x1xi32>
    %cst_15 = arith.constant 0.000000e+00 : f32
    %18 = vector.shape_cast %17 : vector<8x1xi1> to vector<8x1xi1>
    %19 = vector.broadcast %18 : vector<8x1xi1> to vector<8x32xi1>
    %20 = vector.broadcast %cst_15 : f32 to vector<8x32xf32>
    %21 = arith.select %19, %15, %20 : vector<8x32xi1>, vector<8x32xf32>
    %22 = vector.shape_cast %17 : vector<8x1xi1> to vector<8x1xi1>
    %23 = vector.broadcast %22 : vector<8x1xi1> to vector<8x32xi1>
    %24 = arith.select %23, %15, %10 : vector<8x32xi1>, vector<8x32xf32>
    %25 = arith.truncf %21 : vector<8x32xf32> to vector<8x32xbf16>
    %cst_16 = arith.constant dense<0.000000e+00> : vector<8x128xf32>
    %26 = tpu.matmul %25, %8, %cst_16 {dimension_numbers = #tpu.dot_dimension_numbers<[1], [0], [0], [1], [0, 0, 1, 1], [], []>} : vector<8x32xbf16>, vector<32x128xbf16>, vector<8x128xf32> -> vector<8x128xf32>
    %27 = vector.broadcast %9 : vector<1x128xf32> to vector<8x128xf32>
    %28 = arith.addf %26, %27 : vector<8x128xf32>
    %c0_17 = arith.constant 0 : index
    %c0_18 = arith.constant 0 : index
    %29 = vector.load %arg7[%c0_17, %c0_18] : memref<8x1024xf32, #tpu.memory_space<vmem>>, vector<8x128xf32>
    tpu.vector_store %arg7[%c0_17, %c0_18], %28 {strides = array<i32>} : memref<8x1024xf32, #tpu.memory_space<vmem>>, vector<8x128xf32>,
    %30 = arith.truncf %24 : vector<8x32xf32> to vector<8x32xbf16>
    %cst_19 = arith.constant dense<0.000000e+00> : vector<8x32xf32>
    %31 = tpu.matmul %30, %7, %cst_19 {dimension_numbers = #tpu.dot_dimension_numbers<[1], [0], [0], [1], [0, 0, 1, 1], [], []>} : vector<8x32xbf16>, vector<32x32xbf16>, vector<8x32xf32> -> vector<8x32xf32>
    %32 = vector.extract_strided_slice %5 {offsets = [8, 0], sizes = [8, 32], strides = [1, 1]} : vector<64x32xf32> to vector<8x32xf32>
    %33 = arith.addf %31, %32 : vector<8x32xf32>
    %34 = math.tanh %33 : vector<8x32xf32>
    %c1_i32 = arith.constant 1 : i32
    %35 = vector.broadcast %c1_i32 : i32 to vector<8x1xi32>
    %36 = arith.cmpi sgt, %6, %35 : vector<8x1xi32>
    %cst_20 = arith.constant 0.000000e+00 : f32
    %37 = vector.shape_cast %36 : vector<8x1xi1> to vector<8x1xi1>
    %38 = vector.broadcast %37 : vector<8x1xi1> to vector<8x32xi1>
    %39 = vector.broadcast %cst_20 : f32 to vector<8x32xf32>
    %40 = arith.select %38, %34, %39 : vector<8x32xi1>, vector<8x32xf32>
    %41 = vector.shape_cast %36 : vector<8x1xi1> to vector<8x1xi1>
    %42 = vector.broadcast %41 : vector<8x1xi1> to vector<8x32xi1>
    %43 = arith.select %42, %34, %24 : vector<8x32xi1>, vector<8x32xf32>
    %44 = arith.truncf %40 : vector<8x32xf32> to vector<8x32xbf16>
    %cst_21 = arith.constant dense<0.000000e+00> : vector<8x128xf32>
    %45 = tpu.matmul %44, %8, %cst_21 {dimension_numbers = #tpu.dot_dimension_numbers<[1], [0], [0], [1], [0, 0, 1, 1], [], []>} : vector<8x32xbf16>, vector<32x128xbf16>, vector<8x128xf32> -> vector<8x128xf32>
    %46 = vector.broadcast %9 : vector<1x128xf32> to vector<8x128xf32>
    %47 = arith.addf %45, %46 : vector<8x128xf32>
    %c0_22 = arith.constant 0 : index
    %c128 = arith.constant 128 : index
    %48 = vector.load %arg7[%c0_22, %c128] : memref<8x1024xf32, #tpu.memory_space<vmem>>, vector<8x128xf32>
    tpu.vector_store %arg7[%c0_22, %c128], %47 {strides = array<i32>} : memref<8x1024xf32, #tpu.memory_space<vmem>>, vector<8x128xf32>,
    %49 = arith.truncf %43 : vector<8x32xf32> to vector<8x32xbf16>
    %cst_23 = arith.constant dense<0.000000e+00> : vector<8x32xf32>
    %50 = tpu.matmul %49, %7, %cst_23 {dimension_numbers = #tpu.dot_dimension_numbers<[1], [0], [0], [1], [0, 0, 1, 1], [], []>} : vector<8x32xbf16>, vector<32x32xbf16>, vector<8x32xf32> -> vector<8x32xf32>
    %51 = vector.extract_strided_slice %5 {offsets = [16, 0], sizes = [8, 32], strides = [1, 1]} : vector<64x32xf32> to vector<8x32xf32>
    %52 = arith.addf %50, %51 : vector<8x32xf32>
    %53 = math.tanh %52 : vector<8x32xf32>
    %c2_i32 = arith.constant 2 : i32
    %54 = vector.broadcast %c2_i32 : i32 to vector<8x1xi32>
    %55 = arith.cmpi sgt, %6, %54 : vector<8x1xi32>
    %cst_24 = arith.constant 0.000000e+00 : f32
    %56 = vector.shape_cast %55 : vector<8x1xi1> to vector<8x1xi1>
    %57 = vector.broadcast %56 : vector<8x1xi1> to vector<8x32xi1>
    %58 = vector.broadcast %cst_24 : f32 to vector<8x32xf32>
    %59 = arith.select %57, %53, %58 : vector<8x32xi1>, vector<8x32xf32>
    %60 = vector.shape_cast %55 : vector<8x1xi1> to vector<8x1xi1>
    %61 = vector.broadcast %60 : vector<8x1xi1> to vector<8x32xi1>
    %62 = arith.select %61, %53, %43 : vector<8x32xi1>, vector<8x32xf32>
    %63 = arith.truncf %59 : vector<8x32xf32> to vector<8x32xbf16>
    %cst_25 = arith.constant dense<0.000000e+00> : vector<8x128xf32>
    %64 = tpu.matmul %63, %8, %cst_25 {dimension_numbers = #tpu.dot_dimension_numbers<[1], [0], [0], [1], [0, 0, 1, 1], [], []>} : vector<8x32xbf16>, vector<32x128xbf16>, vector<8x128xf32> -> vector<8x128xf32>
    %65 = vector.broadcast %9 : vector<1x128xf32> to vector<8x128xf32>
    %66 = arith.addf %64, %65 : vector<8x128xf32>
    %c0_26 = arith.constant 0 : index
    %c256 = arith.constant 256 : index
    %67 = vector.load %arg7[%c0_26, %c256] : memref<8x1024xf32, #tpu.memory_space<vmem>>, vector<8x128xf32>
    tpu.vector_store %arg7[%c0_26, %c256], %66 {strides = array<i32>} : memref<8x1024xf32, #tpu.memory_space<vmem>>, vector<8x128xf32>,
    %68 = arith.truncf %62 : vector<8x32xf32> to vector<8x32xbf16>
    %cst_27 = arith.constant dense<0.000000e+00> : vector<8x32xf32>
    %69 = tpu.matmul %68, %7, %cst_27 {dimension_numbers = #tpu.dot_dimension_numbers<[1], [0], [0], [1], [0, 0, 1, 1], [], []>} : vector<8x32xbf16>, vector<32x32xbf16>, vector<8x32xf32> -> vector<8x32xf32>
    %70 = vector.extract_strided_slice %5 {offsets = [24, 0], sizes = [8, 32], strides = [1, 1]} : vector<64x32xf32> to vector<8x32xf32>
    %71 = arith.addf %69, %70 : vector<8x32xf32>
    %72 = math.tanh %71 : vector<8x32xf32>
    %c3_i32 = arith.constant 3 : i32
    %73 = vector.broadcast %c3_i32 : i32 to vector<8x1xi32>
    %74 = arith.cmpi sgt, %6, %73 : vector<8x1xi32>
    %cst_28 = arith.constant 0.000000e+00 : f32
    %75 = vector.shape_cast %74 : vector<8x1xi1> to vector<8x1xi1>
    %76 = vector.broadcast %75 : vector<8x1xi1> to vector<8x32xi1>
    %77 = vector.broadcast %cst_28 : f32 to vector<8x32xf32>
    %78 = arith.select %76, %72, %77 : vector<8x32xi1>, vector<8x32xf32>
    %79 = vector.shape_cast %74 : vector<8x1xi1> to vector<8x1xi1>
    %80 = vector.broadcast %79 : vector<8x1xi1> to vector<8x32xi1>
    %81 = arith.select %80, %72, %62 : vector<8x32xi1>, vector<8x32xf32>
    %82 = arith.truncf %78 : vector<8x32xf32> to vector<8x32xbf16>
    %cst_29 = arith.constant dense<0.000000e+00> : vector<8x128xf32>
    %83 = tpu.matmul %82, %8, %cst_29 {dimension_numbers = #tpu.dot_dimension_numbers<[1], [0], [0], [1], [0, 0, 1, 1], [], []>} : vector<8x32xbf16>, vector<32x128xbf16>, vector<8x128xf32> -> vector<8x128xf32>
    %84 = vector.broadcast %9 : vector<1x128xf32> to vector<8x128xf32>
    %85 = arith.addf %83, %84 : vector<8x128xf32>
    %c0_30 = arith.constant 0 : index
    %c384 = arith.constant 384 : index
    %86 = vector.load %arg7[%c0_30, %c384] : memref<8x1024xf32, #tpu.memory_space<vmem>>, vector<8x128xf32>
    tpu.vector_store %arg7[%c0_30, %c384], %85 {strides = array<i32>} : memref<8x1024xf32, #tpu.memory_space<vmem>>, vector<8x128xf32>,
    %87 = arith.truncf %81 : vector<8x32xf32> to vector<8x32xbf16>
    %cst_31 = arith.constant dense<0.000000e+00> : vector<8x32xf32>
    %88 = tpu.matmul %87, %7, %cst_31 {dimension_numbers = #tpu.dot_dimension_numbers<[1], [0], [0], [1], [0, 0, 1, 1], [], []>} : vector<8x32xbf16>, vector<32x32xbf16>, vector<8x32xf32> -> vector<8x32xf32>
    %89 = vector.extract_strided_slice %5 {offsets = [32, 0], sizes = [8, 32], strides = [1, 1]} : vector<64x32xf32> to vector<8x32xf32>
    %90 = arith.addf %88, %89 : vector<8x32xf32>
    %91 = math.tanh %90 : vector<8x32xf32>
    %c4_i32 = arith.constant 4 : i32
    %92 = vector.broadcast %c4_i32 : i32 to vector<8x1xi32>
    %93 = arith.cmpi sgt, %6, %92 : vector<8x1xi32>
    %cst_32 = arith.constant 0.000000e+00 : f32
    %94 = vector.shape_cast %93 : vector<8x1xi1> to vector<8x1xi1>
    %95 = vector.broadcast %94 : vector<8x1xi1> to vector<8x32xi1>
    %96 = vector.broadcast %cst_32 : f32 to vector<8x32xf32>
    %97 = arith.select %95, %91, %96 : vector<8x32xi1>, vector<8x32xf32>
    %98 = vector.shape_cast %93 : vector<8x1xi1> to vector<8x1xi1>
    %99 = vector.broadcast %98 : vector<8x1xi1> to vector<8x32xi1>
    %100 = arith.select %99, %91, %81 : vector<8x32xi1>, vector<8x32xf32>
    %101 = arith.truncf %97 : vector<8x32xf32> to vector<8x32xbf16>
    %cst_33 = arith.constant dense<0.000000e+00> : vector<8x128xf32>
    %102 = tpu.matmul %101, %8, %cst_33 {dimension_numbers = #tpu.dot_dimension_numbers<[1], [0], [0], [1], [0, 0, 1, 1], [], []>} : vector<8x32xbf16>, vector<32x128xbf16>, vector<8x128xf32> -> vector<8x128xf32>
    %103 = vector.broadcast %9 : vector<1x128xf32> to vector<8x128xf32>
    %104 = arith.addf %102, %103 : vector<8x128xf32>
    %c0_34 = arith.constant 0 : index
    %c512 = arith.constant 512 : index
    %105 = vector.load %arg7[%c0_34, %c512] : memref<8x1024xf32, #tpu.memory_space<vmem>>, vector<8x128xf32>
    tpu.vector_store %arg7[%c0_34, %c512], %104 {strides = array<i32>} : memref<8x1024xf32, #tpu.memory_space<vmem>>, vector<8x128xf32>,
    %106 = arith.truncf %100 : vector<8x32xf32> to vector<8x32xbf16>
    %cst_35 = arith.constant dense<0.000000e+00> : vector<8x32xf32>
    %107 = tpu.matmul %106, %7, %cst_35 {dimension_numbers = #tpu.dot_dimension_numbers<[1], [0], [0], [1], [0, 0, 1, 1], [], []>} : vector<8x32xbf16>, vector<32x32xbf16>, vector<8x32xf32> -> vector<8x32xf32>
    %108 = vector.extract_strided_slice %5 {offsets = [40, 0], sizes = [8, 32], strides = [1, 1]} : vector<64x32xf32> to vector<8x32xf32>
    %109 = arith.addf %107, %108 : vector<8x32xf32>
    %110 = math.tanh %109 : vector<8x32xf32>
    %c5_i32 = arith.constant 5 : i32
    %111 = vector.broadcast %c5_i32 : i32 to vector<8x1xi32>
    %112 = arith.cmpi sgt, %6, %111 : vector<8x1xi32>
    %cst_36 = arith.constant 0.000000e+00 : f32
    %113 = vector.shape_cast %112 : vector<8x1xi1> to vector<8x1xi1>
    %114 = vector.broadcast %113 : vector<8x1xi1> to vector<8x32xi1>
    %115 = vector.broadcast %cst_36 : f32 to vector<8x32xf32>
    %116 = arith.select %114, %110, %115 : vector<8x32xi1>, vector<8x32xf32>
    %117 = vector.shape_cast %112 : vector<8x1xi1> to vector<8x1xi1>
    %118 = vector.broadcast %117 : vector<8x1xi1> to vector<8x32xi1>
    %119 = arith.select %118, %110, %100 : vector<8x32xi1>, vector<8x32xf32>
    %120 = arith.truncf %116 : vector<8x32xf32> to vector<8x32xbf16>
    %cst_37 = arith.constant dense<0.000000e+00> : vector<8x128xf32>
    %121 = tpu.matmul %120, %8, %cst_37 {dimension_numbers = #tpu.dot_dimension_numbers<[1], [0], [0], [1], [0, 0, 1, 1], [], []>} : vector<8x32xbf16>, vector<32x128xbf16>, vector<8x128xf32> -> vector<8x128xf32>
    %122 = vector.broadcast %9 : vector<1x128xf32> to vector<8x128xf32>
    %123 = arith.addf %121, %122 : vector<8x128xf32>
    %c0_38 = arith.constant 0 : index
    %c640 = arith.constant 640 : index
    %124 = vector.load %arg7[%c0_38, %c640] : memref<8x1024xf32, #tpu.memory_space<vmem>>, vector<8x128xf32>
    tpu.vector_store %arg7[%c0_38, %c640], %123 {strides = array<i32>} : memref<8x1024xf32, #tpu.memory_space<vmem>>, vector<8x128xf32>,
    %125 = arith.truncf %119 : vector<8x32xf32> to vector<8x32xbf16>
    %cst_39 = arith.constant dense<0.000000e+00> : vector<8x32xf32>
    %126 = tpu.matmul %125, %7, %cst_39 {dimension_numbers = #tpu.dot_dimension_numbers<[1], [0], [0], [1], [0, 0, 1, 1], [], []>} : vector<8x32xbf16>, vector<32x32xbf16>, vector<8x32xf32> -> vector<8x32xf32>
    %127 = vector.extract_strided_slice %5 {offsets = [48, 0], sizes = [8, 32], strides = [1, 1]} : vector<64x32xf32> to vector<8x32xf32>
    %128 = arith.addf %126, %127 : vector<8x32xf32>
    %129 = math.tanh %128 : vector<8x32xf32>
    %c6_i32 = arith.constant 6 : i32
    %130 = vector.broadcast %c6_i32 : i32 to vector<8x1xi32>
    %131 = arith.cmpi sgt, %6, %130 : vector<8x1xi32>
    %cst_40 = arith.constant 0.000000e+00 : f32
    %132 = vector.shape_cast %131 : vector<8x1xi1> to vector<8x1xi1>
    %133 = vector.broadcast %132 : vector<8x1xi1> to vector<8x32xi1>
    %134 = vector.broadcast %cst_40 : f32 to vector<8x32xf32>
    %135 = arith.select %133, %129, %134 : vector<8x32xi1>, vector<8x32xf32>
    %136 = vector.shape_cast %131 : vector<8x1xi1> to vector<8x1xi1>
    %137 = vector.broadcast %136 : vector<8x1xi1> to vector<8x32xi1>
    %138 = arith.select %137, %129, %119 : vector<8x32xi1>, vector<8x32xf32>
    %139 = arith.truncf %135 : vector<8x32xf32> to vector<8x32xbf16>
    %cst_41 = arith.constant dense<0.000000e+00> : vector<8x128xf32>
    %140 = tpu.matmul %139, %8, %cst_41 {dimension_numbers = #tpu.dot_dimension_numbers<[1], [0], [0], [1], [0, 0, 1, 1], [], []>} : vector<8x32xbf16>, vector<32x128xbf16>, vector<8x128xf32> -> vector<8x128xf32>
    %141 = vector.broadcast %9 : vector<1x128xf32> to vector<8x128xf32>
    %142 = arith.addf %140, %141 : vector<8x128xf32>
    %c0_42 = arith.constant 0 : index
    %c768 = arith.constant 768 : index
    %143 = vector.load %arg7[%c0_42, %c768] : memref<8x1024xf32, #tpu.memory_space<vmem>>, vector<8x128xf32>
    tpu.vector_store %arg7[%c0_42, %c768], %142 {strides = array<i32>} : memref<8x1024xf32, #tpu.memory_space<vmem>>, vector<8x128xf32>,
    %144 = arith.truncf %138 : vector<8x32xf32> to vector<8x32xbf16>
    %cst_43 = arith.constant dense<0.000000e+00> : vector<8x32xf32>
    %145 = tpu.matmul %144, %7, %cst_43 {dimension_numbers = #tpu.dot_dimension_numbers<[1], [0], [0], [1], [0, 0, 1, 1], [], []>} : vector<8x32xbf16>, vector<32x32xbf16>, vector<8x32xf32> -> vector<8x32xf32>
    %146 = vector.extract_strided_slice %5 {offsets = [56, 0], sizes = [8, 32], strides = [1, 1]} : vector<64x32xf32> to vector<8x32xf32>
    %147 = arith.addf %145, %146 : vector<8x32xf32>
    %148 = math.tanh %147 : vector<8x32xf32>
    %c7_i32 = arith.constant 7 : i32
    %149 = vector.broadcast %c7_i32 : i32 to vector<8x1xi32>
    %150 = arith.cmpi sgt, %6, %149 : vector<8x1xi32>
    %cst_44 = arith.constant 0.000000e+00 : f32
    %151 = vector.shape_cast %150 : vector<8x1xi1> to vector<8x1xi1>
    %152 = vector.broadcast %151 : vector<8x1xi1> to vector<8x32xi1>
    %153 = vector.broadcast %cst_44 : f32 to vector<8x32xf32>
    %154 = arith.select %152, %148, %153 : vector<8x32xi1>, vector<8x32xf32>
    %155 = arith.truncf %154 : vector<8x32xf32> to vector<8x32xbf16>
    %cst_45 = arith.constant dense<0.000000e+00> : vector<8x128xf32>
    %156 = tpu.matmul %155, %8, %cst_45 {dimension_numbers = #tpu.dot_dimension_numbers<[1], [0], [0], [1], [0, 0, 1, 1], [], []>} : vector<8x32xbf16>, vector<32x128xbf16>, vector<8x128xf32> -> vector<8x128xf32>
    %157 = vector.broadcast %9 : vector<1x128xf32> to vector<8x128xf32>
    %158 = arith.addf %156, %157 : vector<8x128xf32>
    %c0_46 = arith.constant 0 : index
    %c896 = arith.constant 896 : index
    %159 = vector.load %arg7[%c0_46, %c896] : memref<8x1024xf32, #tpu.memory_space<vmem>>, vector<8x128xf32>
    tpu.vector_store %arg7[%c0_46, %c896], %158 {strides = array<i32>} : memref<8x1024xf32, #tpu.memory_space<vmem>>, vector<8x128xf32>,
    return
  }
}

</mosaic_0001>

<bundles_post_ra>
// kernel: decoder_forward.1
= control target key start
LH: loop header
LB: loop body
LE: loop exit
PB: predicated region body
PF: predicated region fallthrough
CT: control target
= control target key end

     0   :  { %v1233_v0 = vmov 0.0   ;;  %vm1234_vm0 = vmmov 0   ;;  %v1235_v3 = vmov 0   ;;  %vm78_vm1 = vcmask 261120   ;;  %s1521_s2 = inlined_call_operand.vmem [shape: bf16[32,32], index: 2, kind: input, shape index: {}]   ;;  %s1522_s3 = inlined_call_operand.vmem [shape: bf16[32,32], index: 3, kind: input, shape index: {}]   ;;  %s1523_s0 = inlined_call_operand.vmem [shape: bf16[64,32], index: 0, kind: input, shape index: {}]   ;;  %s1524_s1 = inlined_call_operand.vmem [shape: s32[8,1], index: 1, kind: input, shape index: {}]   ;;  %s1525_s5 = inlined_call_operand.vmem [shape: bf16[32,128], index: 5, kind: input, shape index: {}]   ;;  %s1526_s4 = inlined_call_operand.vmem [shape: f32[1,32], index: 4, kind: input, shape index: {}]   ;;  %s1527_s6 = inlined_call_operand.vmem [shape: f32[1,128], index: 6, kind: input, shape index: {}]   ;;  %s1528_s7 = inlined_call_operand.vmem [shape: f32[8,1024], index: 7, kind: output, shape index: {}]  }
   0x1   :  { %1074 = vmatprep.subr.bf16.mxu1 %v1233_v0  ;;  %v1207_v1 = vld [vmem:[%s1521_s2 + $0x8] sm:$0xff]   ;;  %1078 = vmatprep.mubr.msk.bf16.mxu1 %vm1234_vm0, %v1233_v0  ;;  %v1209_v4 = vld [vmem:[%s1521_s2] sm:$0xff]   ;;  %v1213_v13 = vld [vmem:[%s1523_s0 + $0x10] sm:$0xff]  }
   0x2   :  { %v1285_v2 = vld [vmem:[%s1522_s3 + $0x8] sm:$0xff]   ;;  %1205 = vset.pattern.permute.xlu0 %v1235_v3  ;;  %1206 = vset.pattern.permute.xlu1 %v1235_v3  ;;  %v1296_v5 = vld [vmem:[%s1522_s3] sm:$0xff]   ;;  %v1214_v14 = vld [vmem:[%s1523_s0 + $0x18] sm:$0xff]  }
   0x3   :  { %1062 = vmatprep.subr.bf16.mxu0 %v1207_v1  ;;  %1075 = vmatpush3.bf16.msra.mxu1 %v1285_v2  ;;  %v1211_v6 = vld [vmem:[%s1523_s0] sm:$0xff]   ;;  %v1212_v7 = vld [vmem:[%s1523_s0 + $0x8] sm:$0xff]  }
   0x4   :  { %1063 = vmatpush3.bf16.msra.mxu0 %v1207_v1  ;;  %1076 = vmatprep.subr.bf16.mxu1 %v1233_v0  ;;  %v1309_v8 = vld [vmem:[%s1524_s1] sm:$0xff]  ;;  %v1343_v15 = vld [vmem:[%s1525_s5 + $0x8] sm:$0xff]  }
   0x5   :  { %1064 = vmatprep.subr.bf16.mxu0 %v1209_v4  ;;  %1066 = vmatprep.mubr.msk.bf16.mxu0 %vm78_vm1, %v1211_v6  ;;  %vm222_vm2 = vcmp.gt.s32.totalorder %v1309_v8, 0  ;;  %vm333_vm3 = vcmp.gt.s32.totalorder %v1309_v8, 1  ;;  %vm627_vm4 = vcmp.gt.s32.totalorder %v1309_v8, 4  ;;  %vm823_vm5 = vcmp.gt.s32.totalorder %v1309_v8, 6  ;;  %v1350_v16 = vld [vmem:[%s1525_s5] sm:$0xff]  }
   0x6   :  { %v223_v9 = vsel %vm222_vm2, 1, %v1235_v3  ;;  %v334_v10 = vsel %vm333_vm3, 1, %v1235_v3  ;;  %v628_v11 = vsel %vm627_vm4, 1, %v1235_v3  ;;  %v824_v12 = vsel %vm823_vm5, 1, %v1235_v3  ;;  %v1359_v19 = vld [vmem:[%s1526_s4] ss:$0 sm:$0xff] }
   0x7   :  { %1077 = vmatpush3.bf16.msra.mxu1 %v1296_v5  ;;  %225 = vperm.xlu0 %1205, %v223_v9   ;;  %vm431_vm7 = vcmp.gt.s32.totalorder %v1309_v8, 2  ;;  %vm529_vm8 = vcmp.gt.s32.totalorder %v1309_v8, 3  ;;  %vm725_vm9 = vcmp.gt.s32.totalorder %v1309_v8, 5  ;;  %vm921_vm10 = vcmp.gt.s32.totalorder %v1309_v8, 7  ;;  %v1397_v40 = vld [vmem:[%s1527_s6] ss:$0 sm:$0xff] }
   0x8   :  { %1065 = vmatpush3.bf16.msra.mxu0 %v1209_v4  ;;  %1082 = vmatprep.subr.bf16.mxu1 %v1233_v0  ;;  %v432_v30 = vsel %vm431_vm7, 1, %v1235_v3  ;;  %v530_v31 = vsel %vm529_vm8, 1, %v1235_v3  ;;  %v726_v32 = vsel %vm725_vm9, 1, %v1235_v3  ;;  %v922_v33 = vsel %vm921_vm10, 1, %v1235_v3 }
   0x9   :  { %1090 = vmatprep.subr.bf16.mxu0 %v1233_v0  ;;  %434 = vperm.xlu1 %1206, %v432_v30  }
   0xa   :  { %1079 = vmatmul.mubr.bf16.vlgmr.msra.gmra.mxu1 %v1235_v3 }
   0xb   :  { %1067 = vmatmul.mubr.msk.bf16.vlgmr.msra.gmra.mxu0 %vm78_vm1, %v1212_v7  ;;  %1086 = vmatprep.mubr.msk.bf16.mxu1 %vm1234_vm0, %v1233_v0 }
   0xc   :  { %1091 = vmatpush3.bf16.msra.mxu0 %v1285_v2  ;;  %336 = vperm.xlu0 %1205, %v334_v10  }
   0xd   :  { %1092 = vmatprep.subr.bf16.mxu0 %v1233_v0  ;;  %1070 = vmatprep.mubr.msk.bf16.mxu0 %vm78_vm1, %v1213_v13 }
   0xe   :  { %1083 = vmatpush3.bf16.msra.mxu1 %v1343_v15  ;;  %532 = vperm.xlu1 %1206, %v530_v31  }
   0xf   :  { %1084 = vmatprep.subr.bf16.mxu1 %v1233_v0 }
  0x10   :  { %1093 = vmatpush3.bf16.msra.mxu0 %v1296_v5  ;;  %630 = vperm.xlu0 %1205, %v628_v11  }
  0x11   :  { %1106 = vmatprep.subr.bf16.mxu0 %v1233_v0 }
  0x12   :  { %1085 = vmatpush3.bf16.msra.mxu1 %v1350_v16  ;;  %728 = vperm.xlu1 %1206, %v726_v32  }
  0x13   :  { %1071 = vmatmul.mubr.msk.bf16.gmra.mxu0 %vm78_vm1, %v1214_v14  ;;  %1098 = vmatprep.subr.bf16.mxu1 %v1233_v0 }
  0x14   :  { %826 = vperm.xlu0 %1205, %v824_v12   ;;  %1094 = vmatprep.mubr.msk.bf16.mxu0 %vm1234_vm0, %v1233_v0 }
  0x16   :  { %924 = vperm.xlu1 %1206, %v922_v33  }
  0x82   :  { %v226_v26 = vpop.permute.xlu0 %225 }
  0x83   :  { %vm227_vm6 = vcmp.eq.s32.totalorder %v226_v26, 1 }
  0x84   :  { %v435_v8 = vpop.permute.xlu1 %434 }
  0x85   :  { %vm436_vm12 = vcmp.eq.s32.totalorder %v435_v8, 1 }
  0x87   :  { %v337_v52 = vpop.permute.xlu0 %336 }
  0x88   :  { %vm338_vm11 = vcmp.eq.s32.totalorder %v337_v52, 1 }
  0xca   :  { %v215_v17 = vpop.f32.mrf.mxu1 }
  0xcb   :  { %v1354_v18 = vpop.f32.mrf.mxu0 }
  0xcc   :  { %v1080_v20 = vpop.f32.mrf.mxu1  ;;  %v134_v58 = vadd.f32 %v1354_v18, %v1359_v19 }
  0xcd   :  { %v125_v21 = vpop.f32.mrf.mxu0 }
  0xce   :  { %v126_v22 = vadd.f32 %v1359_v19, %v125_v21  ;;  %v218_v23 = vpop.f32.mrf.mxu1 }
  0xcf   :  { %v1384_v34 = vpop.f32.mrf.mxu0 }
  0xd0   :  { %v216_v24 = vadd.f32 %v215_v17, %v126_v22  ;;  %v1081_v25 = vpop.f32.mrf.mxu1  ;;  %v137_v14 = vadd.f32 %v1384_v34, %v1359_v19 }
  0xd1   :  { %v128_v35 = vpop.f32.mrf.mxu0 }
  0xd2   :  { %1217 = vtanh.f32 %v216_v24  ;;  %v129_v41 = vadd.f32 %v1359_v19, %v128_v35 }
  0xd3   :  { %v1386_v36 = vpop.f32.mrf.mxu0 }
  0xd5   :  { %v1388_v37 = vpop.f32.mrf.mxu0 }
  0xd6   :  { %v142_v34 = vadd.f32 %v1359_v19, %v1388_v37 }
  0xd7   :  { %v1390_v38 = vpop.f32.mrf.mxu0 }
  0xd9   :  { %v1392_v39 = vpop.f32.mrf.mxu0 }
  0xdf   :  { %v1218_v27 = vpop.eup %1217 }
  0xe0   :  { %v228_v28 = vsel %vm227_vm6, %v1218_v27, 0.0 }
  0xe1   :  { %v229_v29 = vpack.c.bf16 %v228_v28, %v228_v28 }
  0xe3   :  { %1087 = vmatmul.mubr.msk.bf16.vlgmr.msra.gmra.mxu1 %vm78_vm1, %v229_v29  ;;  %1095 = vmatmul.mubr.msk.bf16.vlgmr.msra.gmra.mxu0 %vm78_vm1, %v229_v29 }
  0xe4   :  { %1107 = vmatpush3.bf16.msra.mxu0 %v1285_v2  ;;  %1099 = vmatpush3.bf16.msra.mxu1 %v1343_v15 }
  0xe5   :  { %1108 = vmatprep.subr.bf16.mxu0 %v1233_v0  ;;  %1100 = vmatprep.subr.bf16.mxu1 %v1233_v0 }
  0xe6   :  { %1102 = vmatprep.mubr.msk.bf16.mxu1 %vm1234_vm0, %v1233_v0  ;;  %1110 = vmatprep.mubr.msk.bf16.mxu0 %vm1234_vm0, %v1233_v0 }
  0xe8   :  { %1109 = vmatpush3.bf16.msra.mxu0 %v1296_v5  ;;  %1101 = vmatpush3.bf16.msra.mxu1 %v1350_v16 }
  0xe9   :  { %1122 = vmatprep.subr.bf16.mxu0 %v1233_v0  ;;  %1114 = vmatprep.subr.bf16.mxu1 %v1233_v0 }
 0x1a3   :  { %v285_v42 = vpop.f32.mrf.mxu1  ;;  %v326_v43 = vpop.f32.mrf.mxu0 }
 0x1a4   :  { %v286_v44 = vadd.f32 %v1397_v40, %v285_v42  ;;  %v327_v45 = vadd.f32 %v326_v43, %v129_v41 }
 0x1a5   :  { %v1088_v46 = vpop.f32.mrf.mxu1  ;;  %v1096_v47 = vpop.f32.mrf.mxu0 }
 0x1a6   :  { %291 = vst [vmem:[%s1528_s7] sm:$0xff] %v286_v44  ;;  %1219 = vtanh.f32 %v327_v45 }
 0x1a7   :  { %v288_v48 = vpop.f32.mrf.mxu1  ;;  %v329_v49 = vpop.f32.mrf.mxu0 }
 0x1a9   :  { %v1089_v50 = vpop.f32.mrf.mxu1  ;;  %v1097_v51 = vpop.f32.mrf.mxu0 }
 0x1aa   :  { %v631_v50 = vpop.permute.xlu0 %630 }
 0x1ab   :  { %vm632_vm14 = vcmp.eq.s32.totalorder %v631_v50, 1 }
 0x1b3   :  { %v1220_v53 = vpop.eup %1219 }
 0x1b4   :  { %v339_v54 = vsel %vm338_vm11, %v1220_v53, 0.0  ;;  %v340_v55 = vsel %vm338_vm11, %v1220_v53, %v228_v28  ;;  %v533_v28 = vpop.permute.xlu1 %532 }
 0x1b5   :  { %v341_v56 = vpack.c.bf16 %v339_v54, %v339_v54  ;;  %v386_v57 = vpack.c.bf16 %v340_v55, %v340_v55  ;;  %vm534_vm13 = vcmp.eq.s32.totalorder %v533_v28, 1 }
 0x1b7   :  { %1103 = vmatmul.mubr.msk.bf16.vlgmr.msra.gmra.mxu1 %vm78_vm1, %v341_v56  ;;  %1111 = vmatmul.mubr.msk.bf16.vlgmr.msra.gmra.mxu0 %vm78_vm1, %v386_v57 }
 0x1b8   :  { %1123 = vmatpush3.bf16.msra.mxu0 %v1285_v2  ;;  %1115 = vmatpush3.bf16.msra.mxu1 %v1343_v15 }
 0x1b9   :  { %1124 = vmatprep.subr.bf16.mxu0 %v1233_v0  ;;  %1116 = vmatprep.subr.bf16.mxu1 %v1233_v0 }
 0x1ba   :  { %1118 = vmatprep.mubr.msk.bf16.mxu1 %vm1234_vm0, %v1233_v0  ;;  %1126 = vmatprep.mubr.msk.bf16.mxu0 %vm1234_vm0, %v1233_v0 }
 0x1bc   :  { %1125 = vmatpush3.bf16.msra.mxu0 %v1296_v5  ;;  %1117 = vmatpush3.bf16.msra.mxu1 %v1350_v16 }
 0x1bd   :  { %1138 = vmatprep.subr.bf16.mxu0 %v1233_v0  ;;  %1130 = vmatprep.subr.bf16.mxu1 %v1233_v0 }
 0x277   :  { %v379_v59 = vpop.f32.mrf.mxu1  ;;  %v424_v60 = vpop.f32.mrf.mxu0 }
 0x278   :  { %v380_v61 = vadd.f32 %v1397_v40, %v379_v59  ;;  %v425_v62 = vadd.f32 %v424_v60, %v134_v58 }
 0x279   :  { %v1104_v63 = vpop.f32.mrf.mxu1  ;;  %v1112_v1 = vpop.f32.mrf.mxu0 }
 0x27a   :  { %385 = vst [vmem:[%s1528_s7 + $0x8] sm:$0xff] %v380_v61  ;;  %1221 = vtanh.f32 %v425_v62 }
 0x27b   :  { %v382_v3 = vpop.f32.mrf.mxu1  ;;  %v427_v4 = vpop.f32.mrf.mxu0 }
 0x27c   :  { %v729_v4 = vpop.permute.xlu1 %728 }
 0x27d   :  { %v1105_v6 = vpop.f32.mrf.mxu1  ;;  %v1113_v7 = vpop.f32.mrf.mxu0  ;;  %vm730_vm15 = vcmp.eq.s32.totalorder %v729_v4, 1 }
 0x287   :  { %v1222_v9 = vpop.eup %1221 }
 0x288   :  { %v437_v10 = vsel %vm436_vm12, %v1222_v9, 0.0  ;;  %v438_v11 = vsel %vm436_vm12, %v1222_v9, %v340_v55  ;;  %v145_v55 = vadd.f32 %v1359_v19, %v1392_v39 }
 0x289   :  { %v439_v12 = vpack.c.bf16 %v437_v10, %v437_v10  ;;  %v484_v13 = vpack.c.bf16 %v438_v11, %v438_v11 }
 0x28b   :  { %1119 = vmatmul.mubr.msk.bf16.vlgmr.msra.gmra.mxu1 %vm78_vm1, %v439_v12  ;;  %1127 = vmatmul.mubr.msk.bf16.vlgmr.msra.gmra.mxu0 %vm78_vm1, %v484_v13 }
 0x28c   :  { %1139 = vmatpush3.bf16.msra.mxu0 %v1285_v2  ;;  %1131 = vmatpush3.bf16.msra.mxu1 %v1343_v15 }
 0x28d   :  { %1140 = vmatprep.subr.bf16.mxu0 %v1233_v0  ;;  %1132 = vmatprep.subr.bf16.mxu1 %v1233_v0 }
 0x28e   :  { %1134 = vmatprep.mubr.msk.bf16.mxu1 %vm1234_vm0, %v1233_v0  ;;  %1142 = vmatprep.mubr.msk.bf16.mxu0 %vm1234_vm0, %v1233_v0 }
 0x290   :  { %1141 = vmatpush3.bf16.msra.mxu0 %v1296_v5  ;;  %1133 = vmatpush3.bf16.msra.mxu1 %v1350_v16 }
 0x291   :  { %1154 = vmatprep.subr.bf16.mxu0 %v1233_v0  ;;  %1146 = vmatprep.subr.bf16.mxu1 %v1233_v0 }
 0x34b   :  { %v477_v17 = vpop.f32.mrf.mxu1  ;;  %v522_v18 = vpop.f32.mrf.mxu0 }
 0x34c   :  { %v478_v20 = vadd.f32 %v1397_v40, %v477_v17  ;;  %v523_v21 = vadd.f32 %v522_v18, %v137_v14 }
 0x34d   :  { %v1120_v22 = vpop.f32.mrf.mxu1  ;;  %v1128_v23 = vpop.f32.mrf.mxu0 }
 0x34e   :  { %483 = vst [vmem:[%s1528_s7 + $0x10] sm:$0xff] %v478_v20  ;;  %1223 = vtanh.f32 %v523_v21  ;;  %v827_v22 = vpop.permute.xlu0 %826 }
 0x34f   :  { %v480_v24 = vpop.f32.mrf.mxu1  ;;  %v525_v25 = vpop.f32.mrf.mxu0  ;;  %vm828_vm2 = vcmp.eq.s32.totalorder %v827_v22, 1 }
 0x351   :  { %v1121_v26 = vpop.f32.mrf.mxu1  ;;  %v1129_v27 = vpop.f32.mrf.mxu0 }
 0x352   :  { %v153_v27 = vadd.f32 %v1390_v38, %v1359_v19 }
 0x35b   :  { %v1224_v29 = vpop.eup %1223 }
 0x35c   :  { %v535_v30 = vsel %vm534_vm13, %v1224_v29, 0.0  ;;  %v536_v31 = vsel %vm534_vm13, %v1224_v29, %v438_v11 }
 0x35d   :  { %v537_v32 = vpack.c.bf16 %v535_v30, %v535_v30  ;;  %v582_v33 = vpack.c.bf16 %v536_v31, %v536_v31 }
 0x35f   :  { %1135 = vmatmul.mubr.msk.bf16.vlgmr.msra.gmra.mxu1 %vm78_vm1, %v537_v32  ;;  %1143 = vmatmul.mubr.msk.bf16.vlgmr.msra.gmra.mxu0 %vm78_vm1, %v582_v33 }
 0x360   :  { %1155 = vmatpush3.bf16.msra.mxu0 %v1285_v2  ;;  %1147 = vmatpush3.bf16.msra.mxu1 %v1343_v15 }
 0x361   :  { %1156 = vmatprep.subr.bf16.mxu0 %v1233_v0  ;;  %1148 = vmatprep.subr.bf16.mxu1 %v1233_v0 }
 0x362   :  { %1150 = vmatprep.mubr.msk.bf16.mxu1 %vm1234_vm0, %v1233_v0  ;;  %1158 = vmatprep.mubr.msk.bf16.mxu0 %vm1234_vm0, %v1233_v0 }
 0x364   :  { %1157 = vmatpush3.bf16.msra.mxu0 %v1296_v5  ;;  %1149 = vmatpush3.bf16.msra.mxu1 %v1350_v16 }
 0x365   :  { %1170 = vmatprep.subr.bf16.mxu0 %v1233_v0  ;;  %1162 = vmatprep.subr.bf16.mxu1 %v1233_v0 }
 0x41f   :  { %v575_v35 = vpop.f32.mrf.mxu1  ;;  %v620_v41 = vpop.f32.mrf.mxu0 }
 0x420   :  { %v576_v42 = vadd.f32 %v1397_v40, %v575_v35  ;;  %v621_v43 = vadd.f32 %v620_v41, %v142_v34 }
 0x421   :  { %v1136_v44 = vpop.f32.mrf.mxu1  ;;  %v1144_v45 = vpop.f32.mrf.mxu0 }
 0x422   :  { %581 = vst [vmem:[%s1528_s7 + $0x18] sm:$0xff] %v576_v42  ;;  %1225 = vtanh.f32 %v621_v43 }
 0x423   :  { %v578_v46 = vpop.f32.mrf.mxu1  ;;  %v623_v47 = vpop.f32.mrf.mxu0 }
 0x425   :  { %v1137_v48 = vpop.f32.mrf.mxu1  ;;  %v1145_v49 = vpop.f32.mrf.mxu0 }
 0x42f   :  { %v1226_v51 = vpop.eup %1225 }
 0x430   :  { %v633_v37 = vsel %vm632_vm14, %v1226_v51, 0.0  ;;  %v634_v52 = vsel %vm632_vm14, %v1226_v51, %v536_v31 }
 0x431   :  { %v635_v53 = vpack.c.bf16 %v633_v37, %v633_v37  ;;  %v680_v54 = vpack.c.bf16 %v634_v52, %v634_v52 }
 0x433   :  { %1151 = vmatmul.mubr.msk.bf16.vlgmr.msra.gmra.mxu1 %vm78_vm1, %v635_v53  ;;  %1159 = vmatmul.mubr.msk.bf16.vlgmr.msra.gmra.mxu0 %vm78_vm1, %v680_v54 }
 0x434   :  { %1171 = vmatpush3.bf16.msra.mxu0 %v1285_v2  ;;  %1163 = vmatpush3.bf16.msra.mxu1 %v1343_v15 }
 0x435   :  { %1172 = vmatprep.subr.bf16.mxu0 %v1233_v0  ;;  %1164 = vmatprep.subr.bf16.mxu1 %v1233_v0 }
 0x436   :  { %1166 = vmatprep.mubr.msk.bf16.mxu1 %vm1234_vm0, %v1233_v0  ;;  %1174 = vmatprep.mubr.msk.bf16.mxu0 %vm1234_vm0, %v1233_v0 }
 0x438   :  { %1173 = vmatpush3.bf16.msra.mxu0 %v1296_v5  ;;  %1165 = vmatpush3.bf16.msra.mxu1 %v1350_v16 }
 0x439   :  { %1186 = vmatprep.subr.bf16.mxu0 %v1233_v0  ;;  %1178 = vmatprep.subr.bf16.mxu1 %v1233_v0 }
 0x4f3   :  { %v673_v56 = vpop.f32.mrf.mxu1  ;;  %v718_v57 = vpop.f32.mrf.mxu0 }
 0x4f4   :  { %v674_v58 = vadd.f32 %v1397_v40, %v673_v56  ;;  %v719_v59 = vadd.f32 %v718_v57, %v145_v55 }
 0x4f5   :  { %v1152_v60 = vpop.f32.mrf.mxu1  ;;  %v1160_v61 = vpop.f32.mrf.mxu0 }
 0x4f6   :  { %679 = vst [vmem:[%s1528_s7 + $0x20] sm:$0xff] %v674_v58  ;;  %1227 = vtanh.f32 %v719_v59 }
 0x4f7   :  { %v676_v62 = vpop.f32.mrf.mxu1  ;;  %v721_v63 = vpop.f32.mrf.mxu0 }
 0x4f9   :  { %v1153_v1 = vpop.f32.mrf.mxu1  ;;  %v1161_v3 = vpop.f32.mrf.mxu0 }
 0x503   :  { %v1228_v6 = vpop.eup %1227 }
 0x504   :  { %v731_v39 = vsel %vm730_vm15, %v1228_v6, 0.0  ;;  %v732_v7 = vsel %vm730_vm15, %v1228_v6, %v634_v52 }
 0x505   :  { %v733_v8 = vpack.c.bf16 %v731_v39, %v731_v39  ;;  %v778_v9 = vpack.c.bf16 %v732_v7, %v732_v7 }
 0x507   :  { %1167 = vmatmul.mubr.msk.bf16.vlgmr.msra.gmra.mxu1 %vm78_vm1, %v733_v8  ;;  %1175 = vmatmul.mubr.msk.bf16.vlgmr.msra.gmra.mxu0 %vm78_vm1, %v778_v9 }
 0x508   :  { %1187 = vmatpush3.bf16.msra.mxu0 %v1285_v2  ;;  %1179 = vmatpush3.bf16.msra.mxu1 %v1343_v15  ;;  %v150_v2 = vadd.f32 %v1386_v36, %v1359_v19 }
 0x509   :  { %1188 = vmatprep.subr.bf16.mxu0 %v1233_v0  ;;  %1180 = vmatprep.subr.bf16.mxu1 %v1233_v0 }
 0x50a   :  { %1182 = vmatprep.mubr.msk.bf16.mxu1 %vm1234_vm0, %v1233_v0  ;;  %1190 = vmatprep.mubr.msk.bf16.mxu0 %vm1234_vm0, %v1233_v0 }
 0x50c   :  { %1189 = vmatpush3.bf16.msra.mxu0 %v1296_v5  ;;  %1181 = vmatpush3.bf16.msra.mxu1 %v1350_v16 }
 0x50d   :  { %1194 = vmatprep.subr.bf16.mxu1 %v1233_v0 }
 0x5c7   :  { %v771_v10 = vpop.f32.mrf.mxu1  ;;  %v816_v11 = vpop.f32.mrf.mxu0 }
 0x5c8   :  { %v772_v12 = vadd.f32 %v1397_v40, %v771_v10  ;;  %v817_v13 = vadd.f32 %v816_v11, %v150_v2 }
 0x5c9   :  { %v1168_v14 = vpop.f32.mrf.mxu1  ;;  %v1176_v17 = vpop.f32.mrf.mxu0 }
 0x5ca   :  { %777 = vst [vmem:[%s1528_s7 + $0x28] sm:$0xff] %v772_v12  ;;  %1229 = vtanh.f32 %v817_v13 }
 0x5cb   :  { %v774_v5 = vpop.f32.mrf.mxu1  ;;  %v819_v18 = vpop.f32.mrf.mxu0 }
 0x5cd   :  { %v1169_v20 = vpop.f32.mrf.mxu1  ;;  %v1177_v21 = vpop.f32.mrf.mxu0 }
 0x5d7   :  { %v1230_v23 = vpop.eup %1229 }
 0x5d8   :  { %v829_v36 = vsel %vm828_vm2, %v1230_v23, 0.0  ;;  %v830_v24 = vsel %vm828_vm2, %v1230_v23, %v732_v7 }
 0x5d9   :  { %v831_v25 = vpack.c.bf16 %v829_v36, %v829_v36  ;;  %v876_v26 = vpack.c.bf16 %v830_v24, %v830_v24 }
 0x5db   :  { %1183 = vmatmul.mubr.msk.bf16.vlgmr.msra.gmra.mxu1 %vm78_vm1, %v831_v25  ;;  %1191 = vmatmul.mubr.msk.bf16.vlgmr.msra.gmra.mxu0 %vm78_vm1, %v876_v26 }
 0x5dc   :  { %1195 = vmatpush3.bf16.msra.mxu1 %v1343_v15  ;;  %1198 = vmatprep.mubr.msk.bf16.mxu1 %vm1234_vm0, %v1233_v0 }
 0x5dd   :  { %1196 = vmatprep.subr.bf16.mxu1 %v1233_v0 }
 0x5e0   :  { %1197 = vmatpush3.bf16.msra.mxu1 %v1350_v16  ;;  %v925_v16 = vpop.permute.xlu1 %924 }
 0x5e1   :  { %vm926_vm0 = vcmp.eq.s32.totalorder %v925_v16, 1 }
 0x69b   :  { %v869_v28 = vpop.f32.mrf.mxu1  ;;  %v914_v29 = vpop.f32.mrf.mxu0 }
 0x69c   :  { %v870_v30 = vadd.f32 %v1397_v40, %v869_v28  ;;  %v915_v31 = vadd.f32 %v914_v29, %v153_v27 }
 0x69d   :  { %v1184_v32 = vpop.f32.mrf.mxu1  ;;  %v1192_v33 = vpop.f32.mrf.mxu0 }
 0x69e   :  { %875 = vst [vmem:[%s1528_s7 + $0x30] sm:$0xff] %v870_v30  ;;  %1231 = vtanh.f32 %v915_v31 }
 0x69f   :  { %v872_v15 = vpop.f32.mrf.mxu1  ;;  %v917_v34 = vpop.f32.mrf.mxu0 }
 0x6a1   :  { %v1185_v0 = vpop.f32.mrf.mxu1  ;;  %v1193_v35 = vpop.f32.mrf.mxu0 }
 0x6ab   :  { %v1232_v41 = vpop.eup %1231 }
 0x6ac   :  { %v927_v19 = vsel %vm926_vm0, %v1232_v41, 0.0 }
 0x6ad   :  { %v928_v38 = vpack.c.bf16 %v927_v19, %v927_v19 }
 0x6af   :  { %1199 = vmatmul.mubr.msk.bf16.vlgmr.msra.gmra.mxu1 %vm78_vm1, %v928_v38 }
 0x76f   :  { %v966_v42 = vpop.f32.mrf.mxu1 }
 0x770   :  { %v967_v43 = vadd.f32 %v1397_v40, %v966_v42 }
 0x771   :  { %v1200_v44 = vpop.f32.mrf.mxu1 }
 0x772   :  { %972 = vst [vmem:[%s1528_s7 + $0x38] sm:$0xff] %v967_v43 }
 0x773   :  { %v969_v45 = vpop.f32.mrf.mxu1 }
 0x775   :  { %v1201_v46 = vpop.f32.mrf.mxu1 }

</bundles_post_ra>
